<compile_context>
chip_gen: v6e
topology: v6e:2x2x1
jax: 0.10.0
libtpu: 0.0.40
codegen_flags: <defaults>
</compile_context>

<pallas_src>
import functools
import math

import jax
import jax.numpy as jnp
from jax.experimental import pallas as pl
from jax.experimental.pallas import tpu as pltpu

EXPANSION = 4


# ----------------------------------------------------------------------------
# Pallas kernels
# ----------------------------------------------------------------------------
def _mm_bn_kernel(x_ref, w_ref, s_ref, b_ref, o_ref, *, relu):
    # (TM, K) @ (K, TN) on the MXU (bf16 in, f32 acc), then per-channel
    # scale/bias (+ReLU) on the VPU in f32; store as bf16.
    acc = jnp.dot(x_ref[...], w_ref[...], preferred_element_type=jnp.float32)
    y = acc * s_ref[...] + b_ref[...]
    if relu:
        y = jnp.maximum(y, 0.0)
    o_ref[...] = y.astype(o_ref.dtype)


def _mm_bn_res_kernel(x_ref, w_ref, s_ref, b_ref, r_ref, o_ref, *, relu):
    acc = jnp.dot(x_ref[...], w_ref[...], preferred_element_type=jnp.float32)
    y = acc * s_ref[...] + b_ref[...] + r_ref[...].astype(jnp.float32)
    if relu:
        y = jnp.maximum(y, 0.0)
    o_ref[...] = y.astype(o_ref.dtype)


def _conv3x3_s1_kernel(xm_ref, ha_ref, hb_ref, w_ref, s_ref, b_ref, o_ref, *,
                       relu):
    # Fused 3x3 stride-1 conv + BN + ReLU for one (image, row-block) grid cell.
    # xm_ref: (1, TH, Wp, Cin) main padded rows; ha/hb: (1, 1, Wp, Cin) halos.
    th = xm_ref.shape[1]
    cin = xm_ref.shape[3]
    wo = o_ref.shape[2]
    cout = o_ref.shape[3]
    x = jnp.concatenate([xm_ref[0], ha_ref[0], hb_ref[0]], axis=0)  # (TH+2,Wp,C)
    # Build the 9-tap patch matrix in VMEM; it never touches HBM.
    cols = jnp.concatenate(
        [x[ki:ki + th, kj:kj + wo, :].reshape(th * wo, cin)
         for ki in range(3) for kj in range(3)], axis=-1)           # (TH*Wo,9C)
    acc = jnp.dot(cols, w_ref[...], preferred_element_type=jnp.float32)
    y = acc * s_ref[...] + b_ref[...]
    if relu:
        y = jnp.maximum(y, 0.0)
    o_ref[0] = y.reshape(th, wo, cout).astype(o_ref.dtype)


def _maxpool_kernel(p_ref, o_ref):
    # p_ref: (9, TM, C) stacked 3x3 window taps -> elementwise max over taps.
    o_ref[...] = jnp.max(p_ref[...], axis=0).astype(o_ref.dtype)


def _avgpool_fc_kernel(x_ref, w_ref, b_ref, o_ref):
    # Global average pool over the spatial axis fused with the FC matmul.
    feat = jnp.mean(x_ref[...].astype(jnp.float32), axis=1)        # (TB, C)
    logits = jnp.dot(feat.astype(w_ref.dtype), w_ref[...],
                     preferred_element_type=jnp.float32) + b_ref[...]
    o_ref[...] = logits


# ----------------------------------------------------------------------------
# Fused conv-as-matmul wrapper (1x1 convs, stride-2 3x3 via im2col, stem)
# ----------------------------------------------------------------------------
def _fused_matmul(x, w, scale, bias, residual=None, relu=True,
                  out_dtype=jnp.bfloat16):
    """out = relu_opt((x @ w) * scale + bias [+ residual]).

    x:(M,K) bf16, w:(K,N) bf16, scale/bias:(1,N) f32, residual:(M,N) bf16.
    No host-side padding: blocks that do not divide M/N are handled by the
    Pallas partial-block machinery (masked stores on the last block).
    """
    x = x.astype(jnp.bfloat16)
    w = w.astype(jnp.bfloat16)
    M, K = x.shape
    N = w.shape[1]
    TM = M if M <= 512 else 512
    TN = N if N <= 256 else 256
    ni = pl.cdiv(M, TM)
    nj = pl.cdiv(N, TN)

    # Loop-order heuristic: keep the operand that would otherwise be
    # re-streamed from HBM the most resident across the inner grid axis.
    #   M innermost -> x is re-read nj times, w is read once.
    #   N innermost -> w is re-read ni times, x is read once.
    m_inner = x.size * (nj - 1) <= w.size * (ni - 1)
    if m_inner:
        grid = (nj, ni)
        i_of = lambda a, b: b
        j_of = lambda a, b: a
    else:
        grid = (ni, nj)
        i_of = lambda a, b: a
        j_of = lambda a, b: b

    x_spec = pl.BlockSpec((TM, K), lambda a, b: (i_of(a, b), 0))
    w_spec = pl.BlockSpec((K, TN), lambda a, b: (0, j_of(a, b)))
    v_spec = pl.BlockSpec((1, TN), lambda a, b: (0, j_of(a, b)))
    o_spec = pl.BlockSpec((TM, TN), lambda a, b: (i_of(a, b), j_of(a, b)))
    # Default scoped VMEM (32 MiB) is ample for these tiles on v5e/v6e/v7x.
    cparams = pltpu.CompilerParams(
        dimension_semantics=("parallel", "parallel"))
    out_shape = jax.ShapeDtypeStruct((M, N), out_dtype)

    if residual is None:
        return pl.pallas_call(
            functools.partial(_mm_bn_kernel, relu=relu),
            out_shape=out_shape, grid=grid,
            in_specs=[x_spec, w_spec, v_spec, v_spec],
            out_specs=o_spec, compiler_params=cparams,
        )(x, w, scale, bias)

    r_spec = pl.BlockSpec((TM, TN), lambda a, b: (i_of(a, b), j_of(a, b)))
    return pl.pallas_call(
        functools.partial(_mm_bn_res_kernel, relu=relu),
        out_shape=out_shape, grid=grid,
        in_specs=[x_spec, w_spec, v_spec, v_spec, r_spec],
        out_specs=o_spec, compiler_params=cparams,
    )(x, w, scale, bias, residual.astype(jnp.bfloat16))


# ----------------------------------------------------------------------------
# 3x3 stride-1 conv + BN + ReLU (in-kernel tap gather, no host im2col)
# ----------------------------------------------------------------------------
def _conv3x3_s1(x, p, relu=True):
    N, H, W, C = x.shape
    cout = p["w"].shape[1]
    xp = jnp.pad(x, ((0, 0), (1, 1), (1, 1), (0, 0)))   # conv 'same' zero pad
    Wp = W + 2
    TH = H if H <= 16 else next((c for c in (16, 8, 4, 2) if H % c == 0), 1)
    grid = (N, H // TH)

    main_spec = pl.BlockSpec((1, TH, Wp, C), lambda n, hb: (n, hb, 0, 0))
    halo_a = pl.BlockSpec((1, 1, Wp, C), lambda n, hb: (n, (hb + 1) * TH, 0, 0))
    halo_b = pl.BlockSpec((1, 1, Wp, C),
                          lambda n, hb: (n, (hb + 1) * TH + 1, 0, 0))
    w_spec = pl.BlockSpec((9 * C, cout), lambda n, hb: (0, 0))  # VMEM-resident
    v_spec = pl.BlockSpec((1, cout), lambda n, hb: (0, 0))
    o_spec = pl.BlockSpec((1, TH, W, cout), lambda n, hb: (n, hb, 0, 0))

    return pl.pallas_call(
        functools.partial(_conv3x3_s1_kernel, relu=relu),
        out_shape=jax.ShapeDtypeStruct((N, H, W, cout), jnp.bfloat16),
        grid=grid,
        in_specs=[main_spec, halo_a, halo_b, w_spec, v_spec, v_spec],
        out_specs=o_spec,
        compiler_params=pltpu.CompilerParams(
            dimension_semantics=("parallel", "parallel")),
    )(xp, xp, xp, p["w"], p["scale"], p["bias"])


# ----------------------------------------------------------------------------
# Plain-JAX glue (reshapes / slices only)
# ----------------------------------------------------------------------------
def _flatten_1x1(x, stride):
    """1x1 conv input: optional spatial subsample + flatten to (M, C)."""
    if stride != 1:
        x = x[:, ::stride, ::stride, :]
    N, H, W, C = x.shape
    return x.reshape(N * H * W, C), (N, H, W)


def _im2col(x, k, stride, padding):
    """x: NHWC bf16 -> (N*Ho*Wo, k*k*C), taps ordered (ki, kj, c).

    Only used for the stem (7x7, tiny Cin) and the three stride-2 3x3 convs,
    whose column matrices are small; stride-1 3x3 convs use _conv3x3_s1.
    """
    N, H, W, C = x.shape
    if padding:
        x = jnp.pad(x, ((0, 0), (padding, padding), (padding, padding), (0, 0)))
    Hp, Wp = H + 2 * padding, W + 2 * padding
    Ho = (Hp - k) // stride + 1
    Wo = (Wp - k) // stride + 1
    patches = []
    for ki in range(k):
        for kj in range(k):
            patches.append(
                x[:, ki:ki + stride * (Ho - 1) + 1:stride,
                     kj:kj + stride * (Wo - 1) + 1:stride, :])
    cols = jnp.concatenate(patches, axis=-1)
    return cols.reshape(N * Ho * Wo, k * k * C), (N, Ho, Wo)


def _maxpool_3x3_s2_p1(x):
    # TODO(synk): fold the 9 pooling taps into the kernel with halo rows (as
    # done for the 3x3 conv) to avoid the one-time 9x tap materialization.
    N, H, W, C = x.shape
    xp = jnp.pad(x, ((0, 0), (1, 1), (1, 1), (0, 0)),
                 constant_values=-jnp.inf)
    Ho = (H + 2 - 3) // 2 + 1
    Wo = (W + 2 - 3) // 2 + 1
    taps = [xp[:, ki:ki + 2 * (Ho - 1) + 1:2, kj:kj + 2 * (Wo - 1) + 1:2, :]
            for ki in range(3) for kj in range(3)]
    stacked = jnp.stack(taps, axis=0).reshape(9, N * Ho * Wo, C)
    M = N * Ho * Wo
    TM = M if M <= 1024 else 1024
    out = pl.pallas_call(
        _maxpool_kernel,
        out_shape=jax.ShapeDtypeStruct((M, C), x.dtype),
        grid=(pl.cdiv(M, TM),),
        in_specs=[pl.BlockSpec((9, TM, C), lambda i: (0, i, 0))],
        out_specs=pl.BlockSpec((TM, C), lambda i: (i, 0)),
        compiler_params=pltpu.CompilerParams(
            dimension_semantics=("parallel",)),
    )(stacked)
    return out.reshape(N, Ho, Wo, C)


def _avgpool_fc(x, w, b):
    """Global average pool fused with the final FC layer."""
    N, H, W, C = x.shape
    xr = x.reshape(N, H * W, C)
    ncls = w.shape[1]
    TB = N if N <= 8 else 8
    return pl.pallas_call(
        _avgpool_fc_kernel,
        out_shape=jax.ShapeDtypeStruct((N, ncls), jnp.float32),
        grid=(pl.cdiv(N, TB),),
        in_specs=[pl.BlockSpec((TB, H * W, C), lambda i: (i, 0, 0)),
                  pl.BlockSpec((C, ncls), lambda i: (0, 0)),
                  pl.BlockSpec((1, ncls), lambda i: (0, 0))],
        out_specs=pl.BlockSpec((TB, ncls), lambda i: (i, 0)),
        compiler_params=pltpu.CompilerParams(
            dimension_semantics=("parallel",)),
    )(xr, w.astype(jnp.bfloat16), b)


# ----------------------------------------------------------------------------
# Deterministic synthetic parameters (shapes match the PyTorch __init__)
# ----------------------------------------------------------------------------
def _conv_bn_params(key, cin, cout, k, eps=1e-5):
    ks = jax.random.split(key, 6)
    fan_in = cin * k * k
    w = jax.random.normal(ks[0], (k, k, cin, cout), jnp.float32) / math.sqrt(fan_in)
    conv_b = 0.01 * jax.random.normal(ks[1], (cout,), jnp.float32)
    gamma = 1.0 + 0.05 * jax.random.normal(ks[2], (cout,), jnp.float32)
    beta = 0.05 * jax.random.normal(ks[3], (cout,), jnp.float32)
    mean = 0.05 * jax.random.normal(ks[4], (cout,), jnp.float32)
    var = 1.0 + 0.1 * jax.random.uniform(ks[5], (cout,), jnp.float32)
    scale = gamma / jnp.sqrt(var + eps)
    bias = beta + scale * (conv_b - mean)          # fold conv bias + BN shift
    return {"w": w.reshape(k * k * cin, cout).astype(jnp.bfloat16),
            "scale": scale.reshape(1, cout).astype(jnp.float32),
            "bias": bias.reshape(1, cout).astype(jnp.float32)}


def make_resnet_params(key, layers, image_channels, num_classes):
    params = {}
    key, k = jax.random.split(key)
    params["stem"] = _conv_bn_params(k, image_channels, 64, 7)
    in_ch = 64
    stage_defs = [(layers[0], 64, 1), (layers[1], 128, 2),
                  (layers[2], 256, 2), (layers[3], 512, 2)]
    stages = []
    for nblocks, outc, stride in stage_defs:
        blocks = []
        for bi in range(nblocks):
            s = stride if bi == 0 else 1
            key, k1, k2, k3, kd = jax.random.split(key, 5)
            blk = {
                "conv1": _conv_bn_params(k1, in_ch, outc, 1),
                "conv2": _conv_bn_params(k2, outc, outc, 3),
                "conv3": _conv_bn_params(k3, outc, outc * EXPANSION, 1),
                "stride": s,
            }
            if s != 1 or in_ch != outc * EXPANSION:
                blk["down"] = _conv_bn_params(kd, in_ch, outc * EXPANSION, 1)
            blocks.append(blk)
            in_ch = outc * EXPANSION
        stages.append(blocks)
    params["stages"] = stages
    key, kw, kb = jax.random.split(key, 3)
    fan_in = 512 * EXPANSION
    params["fc_w"] = (jax.random.normal(kw, (fan_in, num_classes), jnp.float32)
                      / math.sqrt(fan_in)).astype(jnp.bfloat16)
    params["fc_b"] = 0.01 * jax.random.normal(kb, (1, num_classes), jnp.float32)
    return params


# ----------------------------------------------------------------------------
# Forward pass
# ----------------------------------------------------------------------------
def _block_forward(x, p):
    N, H, W, C = x.shape
    s = p["stride"]
    outc = p["conv1"]["w"].shape[1]

    # conv1: 1x1 + bn + relu
    cols, _ = _flatten_1x1(x, 1)
    y = _fused_matmul(cols, p["conv1"]["w"], p["conv1"]["scale"],
                      p["conv1"]["bias"], relu=True).reshape(N, H, W, outc)

    # conv2: 3x3 (stride s) + bn + relu
    if s == 1:
        y = _conv3x3_s1(y, p["conv2"], relu=True)
        Ho, Wo = H, W
    else:
        cols, (n, Ho, Wo) = _im2col(y, 3, s, 1)
        y = _fused_matmul(cols, p["conv2"]["w"], p["conv2"]["scale"],
                          p["conv2"]["bias"], relu=True).reshape(N, Ho, Wo, outc)

    # identity path
    if "down" in p:
        idc, _ = _flatten_1x1(x, s)
        identity = _fused_matmul(idc, p["down"]["w"], p["down"]["scale"],
                                 p["down"]["bias"], relu=False)
    else:
        identity = x.reshape(N * H * W, C)

    # conv3: 1x1 + bn + residual add + relu (fused in one kernel)
    cols3 = y.reshape(N * Ho * Wo, outc)
    out = _fused_matmul(cols3, p["conv3"]["w"], p["conv3"]["scale"],
                        p["conv3"]["bias"], residual=identity, relu=True)
    return out.reshape(N, Ho, Wo, outc * EXPANSION)


def resnet_forward(x_nchw, params):
    # Layout: NCHW (PyTorch convention) in, NHWC bf16 internally.
    x = jnp.transpose(x_nchw, (0, 2, 3, 1)).astype(jnp.bfloat16)

    # stem: conv 7x7 s2 p3 + bn + relu, then maxpool 3x3 s2 p1
    cols, (n, h, w_) = _im2col(x, 7, 2, 3)
    stem = params["stem"]
    y = _fused_matmul(cols, stem["w"], stem["scale"], stem["bias"],
                      relu=True).reshape(n, h, w_, 64)
    y = _maxpool_3x3_s2_p1(y)

    for blocks in params["stages"]:
        for blk in blocks:
            y = _block_forward(y, blk)

    # global average pool fused with the FC layer -> (N, num_classes) f32
    return _avgpool_fc(y, params["fc_w"], params["fc_b"])


if __name__ == "__main__":
    key = jax.random.PRNGKey(0)
    kx, kp = jax.random.split(key)
    # small input consistent with the module: NCHW, RGB image, 32x32 spatial
    x = jax.random.uniform(kx, (2, 3, 32, 32), jnp.float32)
    params = make_resnet_params(kp, layers=[1, 1, 1, 1],
                                image_channels=3, num_classes=10)
    out = resnet_forward(x, params)
    out = jax.block_until_ready(out)
    assert out.shape == (2, 10), out.shape
    assert bool(jnp.all(jnp.isfinite(out)))
    print("KERNEL_OK")
</pallas_src>

<mosaic_0001>
module attributes {stable_mosaic.version = 11 : i64} {
  func.func @_mm_bn_kernel(%arg0: i32, %arg1: i32, %arg2: memref<512x147xbf16, #tpu.memory_space<vmem>>, %arg3: memref<147x64xbf16, #tpu.memory_space<vmem>>, %arg4: memref<1x64xf32, #tpu.memory_space<vmem>>, %arg5: memref<1x64xf32, #tpu.memory_space<vmem>>, %arg6: memref<512x64xbf16, #tpu.memory_space<vmem>>) attributes {dimension_semantics = [#tpu.dimension_semantics<parallel>, #tpu.dimension_semantics<parallel>], iteration_bounds = array<i64: 1, 1>, scalar_prefetch = 0 : i64, scratch_operands = 0 : i64, tpu.core_type = #tpu.core_type<tc>, window_params = [{transform_indices = @transform_0, window_bounds = array<i64: 512, 147>}, {transform_indices = @transform_1, window_bounds = array<i64: 147, 64>}, {transform_indices = @transform_2, window_bounds = array<i64: 1, 64>}, {transform_indices = @transform_3, window_bounds = array<i64: 1, 64>}, {transform_indices = @transform_4, window_bounds = array<i64: 512, 64>}]} {
    %c0 = arith.constant 0 : index
    %c0_0 = arith.constant 0 : index
    %0 = vector.load %arg2[%c0, %c0_0] : memref<512x147xbf16, #tpu.memory_space<vmem>>, vector<512x147xbf16>
    %c0_1 = arith.constant 0 : index
    %c0_2 = arith.constant 0 : index
    %1 = vector.load %arg3[%c0_1, %c0_2] : memref<147x64xbf16, #tpu.memory_space<vmem>>, vector<147x64xbf16>
    %cst = arith.constant dense<0.000000e+00> : vector<512x64xf32>
    %2 = tpu.matmul %0, %1, %cst {dimension_numbers = #tpu.dot_dimension_numbers<[1], [0], [0], [1], [0, 0, 1, 1], [], []>} : vector<512x147xbf16>, vector<147x64xbf16>, vector<512x64xf32> -> vector<512x64xf32>
    %c0_3 = arith.constant 0 : index
    %c0_4 = arith.constant 0 : index
    %3 = vector.load %arg4[%c0_3, %c0_4] : memref<1x64xf32, #tpu.memory_space<vmem>>, vector<1x64xf32>
    %4 = vector.broadcast %3 : vector<1x64xf32> to vector<512x64xf32>
    %5 = arith.mulf %2, %4 : vector<512x64xf32>
    %c0_5 = arith.constant 0 : index
    %c0_6 = arith.constant 0 : index
    %6 = vector.load %arg5[%c0_5, %c0_6] : memref<1x64xf32, #tpu.memory_space<vmem>>, vector<1x64xf32>
    %7 = vector.broadcast %6 : vector<1x64xf32> to vector<512x64xf32>
    %8 = arith.addf %5, %7 : vector<512x64xf32>
    %cst_7 = arith.constant 0.000000e+00 : f32
    %9 = vector.broadcast %cst_7 : f32 to vector<512x64xf32>
    %10 = arith.maximumf %8, %9 : vector<512x64xf32>
    %11 = arith.truncf %10 : vector<512x64xf32> to vector<512x64xbf16>
    %c0_8 = arith.constant 0 : index
    %c0_9 = arith.constant 0 : index
    %12 = vector.load %arg6[%c0_8, %c0_9] : memref<512x64xbf16, #tpu.memory_space<vmem>>, vector<512x64xbf16>
    tpu.vector_store %arg6[%c0_8, %c0_9], %11 {strides = array<i32>} : memref<512x64xbf16, #tpu.memory_space<vmem>>, vector<512x64xbf16>,
    return
  }
  func.func @transform_0(%arg0: i32, %arg1: i32) -> (i32, i32) {
    %c0_i32 = arith.constant 0 : i32
    %c0_i32_0 = arith.constant 0 : i32
    return %arg1, %c0_i32 : i32, i32
  }
  func.func @transform_1(%arg0: i32, %arg1: i32) -> (i32, i32) {
    %c0_i32 = arith.constant 0 : i32
    %c0_i32_0 = arith.constant 0 : i32
    return %c0_i32, %arg0 : i32, i32
  }
  func.func @transform_2(%arg0: i32, %arg1: i32) -> (i32, i32) {
    %c0_i32 = arith.constant 0 : i32
    %c0_i32_0 = arith.constant 0 : i32
    return %c0_i32, %arg0 : i32, i32
  }
  func.func @transform_3(%arg0: i32, %arg1: i32) -> (i32, i32) {
    %c0_i32 = arith.constant 0 : i32
    %c0_i32_0 = arith.constant 0 : i32
    return %c0_i32, %arg0 : i32, i32
  }
  func.func @transform_4(%arg0: i32, %arg1: i32) -> (i32, i32) {
    %c0_i32 = arith.constant 0 : i32
    return %arg1, %arg0 : i32, i32
  }
}

</mosaic_0001>

<bundles_post_ra>
// kernel: tpu_custom_call.1
= control target key start
LH: loop header
LB: loop body
LE: loop exit
PB: predicated region body
PF: predicated region fallthrough
CT: control target
= control target key end

     0   :  { %v1734_v0 = vmov 0   ;;  %vm446_vm0 = vcmask 154624   ;;  %vm543_vm1 = vcmask 1040384   ;;  %vm544_vm2 = vcmask 1041408   ;;  %s2409_s1 = inlined_call_operand.vmem [shape: bf16[147,64], index: 1, kind: input, shape index: {}]   ;;  %s2410_s0 = inlined_call_operand.vmem [shape: bf16[512,147], index: 0, kind: input, shape index: {}]   ;;  %s2411_s2 = inlined_call_operand.vmem [shape: f32[1,64], index: 2, kind: input, shape index: {}]   ;;  %s2412_s3 = inlined_call_operand.vmem [shape: f32[1,64], index: 3, kind: input, shape index: {}]   ;;  %s2413_s4 = inlined_call_operand.vmem [shape: bf16[512,64], index: 4, kind: output, shape index: {}]  }
   0x1   :  { %550 = vmatprep.subr.bf16.mxu0 %v1734_v0  ;;  %1606 = vmatprep.subr.bf16.mxu1 %v1734_v0  ;;  %v1628_v1 = vld [vmem:[%s2409_s1 + $0x38] sm:$0xff]   ;;  %v1629_v2 = vld [vmem:[%s2409_s1 + $0x30] sm:$0xff]   ;;  %v1630_v3 = vld [vmem:[%s2409_s1 + $0x28] sm:$0xff]   ;;  %v1735_v10 = vmov 65535   ;;  %vm1301_vm3 = vcmask 519168  }
   0x2   :  { %551 = vmatpush1.bf16.msra.mxu0 %v1628_v1  ;;  %1616 = vmatpush1.bf16.msra.mxu1 %v1628_v1  ;;  %v1631_v4 = vld [vmem:[%s2409_s1 + $0x20] sm:$0xff]   ;;  %v1632_v7 = vld [vmem:[%s2409_s1 + $0x18] sm:$0xff]   ;;  %v1633_v8 = vld [vmem:[%s2409_s1 + $0x10] sm:$0xff]   ;;  %v545_v11 = vsel %vm543_vm1, 4294967295, %v1735_v10 }
   0x3   :  { %552 = vmatprep.subr.bf16.mxu0 %v1734_v0  ;;  %1607 = vmatprep.subr.bf16.mxu1 %v1734_v0  ;;  %v1640_v5 = vld [vmem:[%s2410_s0 + $0x4] ss:$8 sps:$4 sm:$0xff]   ;;  %v1636_v13 = vld [vmem:[%s2409_s1 + $0x48] ss:$0 sps:$4 sm:$0x33]   ;;  %v546_v14 = vsel %vm544_vm2, %v545_v11, 0 }
   0x4   :  { %1444 = vmatprep.mubr.msk.bf16.mxu0 %vm446_vm0, %v1640_v5  ;;  %v1643_v6 = vld [vmem:[%s2410_s0 + $0x104] ss:$8 sps:$4 sm:$0xff]   ;;  %v548_v15 = vand.u32 %v1636_v13, %v546_v14  ;;  %v1638_v17 = vld [vmem:[%s2410_s0] ss:$8 sps:$4 sm:$0xff]   ;;  %v1644_v19 = vld [vmem:[%s2410_s0 + $0x14] ss:$8 sps:$4 sm:$0xff]  }
   0x5   :  { %1460 = vmatprep.mubr.msk.bf16.mxu1 %vm446_vm0, %v1643_v6  ;;  %v1634_v9 = vld [vmem:[%s2409_s1 + $0x8] sm:$0xff]   ;;  %v1635_v12 = vld [vmem:[%s2409_s1] sm:$0xff]   ;;  %v1646_v20 = vld [vmem:[%s2410_s0 + $0x114] ss:$8 sps:$4 sm:$0xff]  }
   0x6   :  { %553 = vmatpush1.bf16.msra.mxu0 %v1629_v2  ;;  %1617 = vmatpush1.bf16.msra.mxu1 %v1629_v2  ;;  %v1637_v16 = vld [vmem:[%s2409_s1 + $0x40] sm:$0xff]   ;;  %v1648_v21 = vld [vmem:[%s2410_s0 + $0x10] ss:$8 sps:$4 sm:$0xff]   ;;  %v1656_v27 = vld [vmem:[%s2410_s0 + $0x34] ss:$8 sps:$4 sm:$0xff]  }
   0x7   :  { %554 = vmatprep.subr.bf16.mxu0 %v1734_v0  ;;  %1608 = vmatprep.subr.bf16.mxu1 %v1734_v0  ;;  %v1641_v18 = vld [vmem:[%s2410_s0 + $0x100] ss:$8 sps:$4 sm:$0xff]   ;;  %v1649_v22 = vld [vmem:[%s2410_s0 + $0x110] ss:$8 sps:$4 sm:$0xff]   ;;  %v1650_v23 = vld [vmem:[%s2410_s0 + $0x24] ss:$8 sps:$4 sm:$0xff]  }
   0x8   :  { %v1652_v24 = vld [vmem:[%s2410_s0 + $0x124] ss:$8 sps:$4 sm:$0xff]   ;;  %v1654_v25 = vld [vmem:[%s2410_s0 + $0x20] ss:$8 sps:$4 sm:$0xff]   ;;  %v1658_v28 = vld [vmem:[%s2410_s0 + $0x134] ss:$8 sps:$4 sm:$0xff]  }
   0x9   :  { %v1655_v26 = vld [vmem:[%s2410_s0 + $0x120] ss:$8 sps:$4 sm:$0xff]   ;;  %v1660_v29 = vld [vmem:[%s2410_s0 + $0x30] ss:$8 sps:$4 sm:$0xff]   ;;  %v1662_v31 = vld [vmem:[%s2410_s0 + $0x44] ss:$8 sps:$4 sm:$0xff]  }
   0xa   :  { %555 = vmatpush1.bf16.msra.mxu0 %v1630_v3  ;;  %1618 = vmatpush1.bf16.msra.mxu1 %v1630_v3  ;;  %v1661_v30 = vld [vmem:[%s2410_s0 + $0x130] ss:$8 sps:$4 sm:$0xff]   ;;  %v1664_v32 = vld [vmem:[%s2410_s0 + $0x144] ss:$8 sps:$4 sm:$0xff]   ;;  %v1666_v33 = vld [vmem:[%s2410_s0 + $0x40] ss:$8 sps:$4 sm:$0xff]  }
   0xb   :  { %556 = vmatprep.subr.bf16.mxu0 %v1734_v0  ;;  %1609 = vmatprep.subr.bf16.mxu1 %v1734_v0  ;;  %v1667_v34 = vld [vmem:[%s2410_s0 + $0x140] ss:$8 sps:$4 sm:$0xff]   ;;  %v1668_v35 = vld [vmem:[%s2410_s0 + $0x54] ss:$8 sps:$4 sm:$0xff]   ;;  %v1672_v37 = vld [vmem:[%s2410_s0 + $0x50] ss:$8 sps:$4 sm:$0xff]  }
   0xc   :  { %v1670_v36 = vld [vmem:[%s2410_s0 + $0x154] ss:$8 sps:$4 sm:$0xff]   ;;  %v1673_v38 = vld [vmem:[%s2410_s0 + $0x150] ss:$8 sps:$4 sm:$0xff]   ;;  %v1674_v39 = vld [vmem:[%s2410_s0 + $0x64] ss:$8 sps:$4 sm:$0xff]  }
   0xd   :  { %v1676_v40 = vld [vmem:[%s2410_s0 + $0x164] ss:$8 sps:$4 sm:$0xff]   ;;  %v1678_v41 = vld [vmem:[%s2410_s0 + $0x60] ss:$8 sps:$4 sm:$0xff]   ;;  %v1680_v43 = vld [vmem:[%s2410_s0 + $0x74] ss:$8 sps:$4 sm:$0xff]  }
   0xe   :  { %557 = vmatpush1.bf16.msra.mxu0 %v1631_v4  ;;  %1619 = vmatpush1.bf16.msra.mxu1 %v1631_v4  ;;  %v1679_v42 = vld [vmem:[%s2410_s0 + $0x160] ss:$8 sps:$4 sm:$0xff]   ;;  %v1682_v44 = vld [vmem:[%s2410_s0 + $0x174] ss:$8 sps:$4 sm:$0xff]   ;;  %v1684_v45 = vld [vmem:[%s2410_s0 + $0x70] ss:$8 sps:$4 sm:$0xff]  }
   0xf   :  { %558 = vmatprep.subr.bf16.mxu0 %v1734_v0  ;;  %1610 = vmatprep.subr.bf16.mxu1 %v1734_v0  ;;  %v1685_v46 = vld [vmem:[%s2410_s0 + $0x170] ss:$8 sps:$4 sm:$0xff]   ;;  %v1686_v47 = vld [vmem:[%s2410_s0 + $0x84] ss:$8 sps:$4 sm:$0xff]   ;;  %v1690_v49 = vld [vmem:[%s2410_s0 + $0x80] ss:$8 sps:$4 sm:$0xff]  }
  0x10   :  { %v1688_v48 = vld [vmem:[%s2410_s0 + $0x184] ss:$8 sps:$4 sm:$0xff]   ;;  %v1691_v50 = vld [vmem:[%s2410_s0 + $0x180] ss:$8 sps:$4 sm:$0xff]   ;;  %v1692_v51 = vld [vmem:[%s2410_s0 + $0x94] ss:$8 sps:$4 sm:$0xff]  }
  0x11   :  { %v1694_v52 = vld [vmem:[%s2410_s0 + $0x194] ss:$8 sps:$4 sm:$0xff]   ;;  %v1696_v53 = vld [vmem:[%s2410_s0 + $0x90] ss:$8 sps:$4 sm:$0xff]   ;;  %v1698_v55 = vld [vmem:[%s2410_s0 + $0xa4] ss:$8 sps:$4 sm:$0xff]  }
  0x12   :  { %559 = vmatpush1.bf16.msra.mxu0 %v1632_v7  ;;  %1620 = vmatpush1.bf16.msra.mxu1 %v1632_v7  ;;  %v1697_v54 = vld [vmem:[%s2410_s0 + $0x190] ss:$8 sps:$4 sm:$0xff]   ;;  %v1700_v56 = vld [vmem:[%s2410_s0 + $0x1a4] ss:$8 sps:$4 sm:$0xff]   ;;  %v1702_v57 = vld [vmem:[%s2410_s0 + $0xa0] ss:$8 sps:$4 sm:$0xff]  }
  0x13   :  { %560 = vmatprep.subr.bf16.mxu0 %v1734_v0  ;;  %1611 = vmatprep.subr.bf16.mxu1 %v1734_v0  ;;  %v1703_v58 = vld [vmem:[%s2410_s0 + $0x1a0] ss:$8 sps:$4 sm:$0xff]   ;;  %v1704_v59 = vld [vmem:[%s2410_s0 + $0xb4] ss:$8 sps:$4 sm:$0xff]   ;;  %v1708_v61 = vld [vmem:[%s2410_s0 + $0xb0] ss:$8 sps:$4 sm:$0xff]  }
  0x14   :  { %v1706_v60 = vld [vmem:[%s2410_s0 + $0x1b4] ss:$8 sps:$4 sm:$0xff]   ;;  %v1709_v62 = vld [vmem:[%s2410_s0 + $0x1b0] ss:$8 sps:$4 sm:$0xff]   ;;  %v1710_v63 = vld [vmem:[%s2410_s0 + $0xc4] ss:$8 sps:$4 sm:$0xff]  }
  0x15   :  { %v1714_v1 = vld [vmem:[%s2410_s0 + $0xc0] ss:$8 sps:$4 sm:$0xff]   ;;  %v1716_v3 = vld [vmem:[%s2410_s0 + $0xd4] ss:$8 sps:$4 sm:$0xff]   ;;  %v1720_v5 = vld [vmem:[%s2410_s0 + $0xd0] ss:$8 sps:$4 sm:$0xff]  }
  0x16   :  { %561 = vmatpush1.bf16.msra.mxu0 %v1633_v8  ;;  %1621 = vmatpush1.bf16.msra.mxu1 %v1633_v8  ;;  %v1715_v2 = vld [vmem:[%s2410_s0 + $0x1c0] ss:$8 sps:$4 sm:$0xff]   ;;  %v1718_v4 = vld [vmem:[%s2410_s0 + $0x1d4] ss:$8 sps:$4 sm:$0xff]   ;;  %v1721_v6 = vld [vmem:[%s2410_s0 + $0x1d0] ss:$8 sps:$4 sm:$0xff]  }
  0x17   :  { %562 = vmatprep.subr.bf16.mxu0 %v1734_v0  ;;  %1612 = vmatprep.subr.bf16.mxu1 %v1734_v0  ;;  %v1722_v7 = vld [vmem:[%s2410_s0 + $0xe4] ss:$8 sps:$4 sm:$0xff]   ;;  %v1727_v10 = vld [vmem:[%s2410_s0 + $0x1e0] ss:$8 sps:$4 sm:$0xff]   ;;  %v1728_v11 = vld [vmem:[%s2410_s0 + $0xf4] ss:$8 sps:$4 sm:$0xff]  }
  0x18   :  { %v1724_v8 = vld [vmem:[%s2410_s0 + $0x1e4] ss:$8 sps:$4 sm:$0xff]   ;;  %v1732_v13 = vld [vmem:[%s2410_s0 + $0xf0] ss:$8 sps:$4 sm:$0xff]  }
  0x19   :  { %v1733_v14 = vld [vmem:[%s2410_s0 + $0x1f0] ss:$8 sps:$4 sm:$0xff]  }
  0x1a   :  { %563 = vmatpush1.bf16.msra.mxu0 %v1634_v9  ;;  %1622 = vmatpush1.bf16.msra.mxu1 %v1634_v9  ;;  %v1726_v9 = vld [vmem:[%s2410_s0 + $0xe0] ss:$8 sps:$4 sm:$0xff]  }
  0x1b   :  { %564 = vmatprep.subr.bf16.mxu0 %v1734_v0  ;;  %1613 = vmatprep.subr.bf16.mxu1 %v1734_v0 }
  0x1e   :  { %565 = vmatpush1.bf16.msra.mxu0 %v1635_v12  ;;  %1623 = vmatpush1.bf16.msra.mxu1 %v1635_v12  ;;  %v1730_v12 = vld [vmem:[%s2410_s0 + $0x1f4] ss:$8 sps:$4 sm:$0xff]  }
  0x1f   :  { %578 = vmatprep.subr.bf16.mxu0 %v1734_v0  ;;  %1614 = vmatprep.subr.bf16.mxu1 %v1734_v0 }
  0x22   :  { %579 = vmatpush2.bf16.msra.mxu0 %v548_v15  ;;  %1624 = vmatpush2.bf16.msra.mxu1 %v548_v15  ;;  %v2018_v15 = vld [vmem:[%s2411_s2] ss:$0 sm:$0xff] }
  0x23   :  { %580 = vmatprep.subr.bf16.mxu0 %v1734_v0  ;;  %1615 = vmatprep.subr.bf16.mxu1 %v1734_v0  ;;  %v1712_v0 = vld [vmem:[%s2410_s0 + $0x1c4] ss:$8 sps:$4 sm:$0xff]  }
  0x26   :  { %581 = vmatpush2.bf16.msra.mxu0 %v1637_v16  ;;  %1625 = vmatpush2.bf16.msra.mxu1 %v1637_v16 }
  0x29   :  { %583 = vmatmul.mubr.bf16.vlgmr.msra.gmra.mxu0 %v1638_v17  ;;  %711 = vmatmul.mubr.bf16.vlgmr.msra.gmra.mxu1 %v1641_v18  ;;  %v2023_v17 = vld [vmem:[%s2412_s3] ss:$0 sm:$0xff] }
  0x2a   :  { %1445 = vmatprep.mubr.msk.bf16.mxu0 %vm446_vm0, %v1644_v19  ;;  %1461 = vmatprep.mubr.msk.bf16.mxu1 %vm446_vm0, %v1646_v20 }
  0x31   :  { %591 = vmatmul.mubr.bf16.gmra.mxu0 %v1648_v21  ;;  %719 = vmatmul.mubr.bf16.gmra.mxu1 %v1649_v22 }
  0x32   :  { %1446 = vmatprep.mubr.msk.bf16.mxu0 %vm446_vm0, %v1650_v23  ;;  %1462 = vmatprep.mubr.msk.bf16.mxu1 %vm446_vm0, %v1652_v24 }
  0x39   :  { %599 = vmatmul.mubr.bf16.gmra.mxu0 %v1654_v25  ;;  %727 = vmatmul.mubr.bf16.gmra.mxu1 %v1655_v26 }
  0x3a   :  { %1447 = vmatprep.mubr.msk.bf16.mxu0 %vm446_vm0, %v1656_v27  ;;  %1463 = vmatprep.mubr.msk.bf16.mxu1 %vm446_vm0, %v1658_v28 }
  0x41   :  { %607 = vmatmul.mubr.bf16.gmra.mxu0 %v1660_v29  ;;  %735 = vmatmul.mubr.bf16.gmra.mxu1 %v1661_v30 }
  0x42   :  { %1448 = vmatprep.mubr.msk.bf16.mxu0 %vm446_vm0, %v1662_v31  ;;  %1464 = vmatprep.mubr.msk.bf16.mxu1 %vm446_vm0, %v1664_v32 }
  0x49   :  { %615 = vmatmul.mubr.bf16.gmra.mxu0 %v1666_v33  ;;  %743 = vmatmul.mubr.bf16.gmra.mxu1 %v1667_v34 }
  0x4a   :  { %1449 = vmatprep.mubr.msk.bf16.mxu0 %vm446_vm0, %v1668_v35  ;;  %1465 = vmatprep.mubr.msk.bf16.mxu1 %vm446_vm0, %v1670_v36 }
  0x51   :  { %623 = vmatmul.mubr.bf16.gmra.mxu0 %v1672_v37  ;;  %751 = vmatmul.mubr.bf16.gmra.mxu1 %v1673_v38 }
  0x52   :  { %1450 = vmatprep.mubr.msk.bf16.mxu0 %vm446_vm0, %v1674_v39  ;;  %1466 = vmatprep.mubr.msk.bf16.mxu1 %vm446_vm0, %v1676_v40 }
  0x59   :  { %631 = vmatmul.mubr.bf16.gmra.mxu0 %v1678_v41  ;;  %759 = vmatmul.mubr.bf16.gmra.mxu1 %v1679_v42 }
  0x5a   :  { %1451 = vmatprep.mubr.msk.bf16.mxu0 %vm446_vm0, %v1680_v43  ;;  %1467 = vmatprep.mubr.msk.bf16.mxu1 %vm446_vm0, %v1682_v44 }
  0x61   :  { %639 = vmatmul.mubr.bf16.gmra.mxu0 %v1684_v45  ;;  %767 = vmatmul.mubr.bf16.gmra.mxu1 %v1685_v46 }
  0x62   :  { %1452 = vmatprep.mubr.msk.bf16.mxu0 %vm446_vm0, %v1686_v47  ;;  %1468 = vmatprep.mubr.msk.bf16.mxu1 %vm446_vm0, %v1688_v48 }
  0x69   :  { %647 = vmatmul.mubr.bf16.gmra.mxu0 %v1690_v49  ;;  %775 = vmatmul.mubr.bf16.gmra.mxu1 %v1691_v50 }
  0x6a   :  { %1453 = vmatprep.mubr.msk.bf16.mxu0 %vm446_vm0, %v1692_v51  ;;  %1469 = vmatprep.mubr.msk.bf16.mxu1 %vm446_vm0, %v1694_v52 }
  0x71   :  { %655 = vmatmul.mubr.bf16.gmra.mxu0 %v1696_v53  ;;  %783 = vmatmul.mubr.bf16.gmra.mxu1 %v1697_v54 }
  0x72   :  { %1454 = vmatprep.mubr.msk.bf16.mxu0 %vm446_vm0, %v1698_v55  ;;  %1470 = vmatprep.mubr.msk.bf16.mxu1 %vm446_vm0, %v1700_v56 }
  0x79   :  { %663 = vmatmul.mubr.bf16.gmra.mxu0 %v1702_v57  ;;  %791 = vmatmul.mubr.bf16.gmra.mxu1 %v1703_v58 }
  0x7a   :  { %1455 = vmatprep.mubr.msk.bf16.mxu0 %vm446_vm0, %v1704_v59  ;;  %1471 = vmatprep.mubr.msk.bf16.mxu1 %vm446_vm0, %v1706_v60 }
  0x81   :  { %671 = vmatmul.mubr.bf16.gmra.mxu0 %v1708_v61  ;;  %799 = vmatmul.mubr.bf16.gmra.mxu1 %v1709_v62 }
  0x82   :  { %1456 = vmatprep.mubr.msk.bf16.mxu0 %vm446_vm0, %v1710_v63  ;;  %1472 = vmatprep.mubr.msk.bf16.mxu1 %vm446_vm0, %v1712_v0 }
  0x89   :  { %679 = vmatmul.mubr.bf16.gmra.mxu0 %v1714_v1  ;;  %807 = vmatmul.mubr.bf16.gmra.mxu1 %v1715_v2 }
  0x8a   :  { %1457 = vmatprep.mubr.msk.bf16.mxu0 %vm446_vm0, %v1716_v3  ;;  %1473 = vmatprep.mubr.msk.bf16.mxu1 %vm446_vm0, %v1718_v4 }
  0x91   :  { %687 = vmatmul.mubr.bf16.gmra.mxu0 %v1720_v5  ;;  %815 = vmatmul.mubr.bf16.gmra.mxu1 %v1721_v6 }
  0x92   :  { %1458 = vmatprep.mubr.msk.bf16.mxu0 %vm446_vm0, %v1722_v7  ;;  %1474 = vmatprep.mubr.msk.bf16.mxu1 %vm446_vm0, %v1724_v8 }
  0x99   :  { %695 = vmatmul.mubr.bf16.gmra.mxu0 %v1726_v9  ;;  %823 = vmatmul.mubr.bf16.gmra.mxu1 %v1727_v10 }
  0x9a   :  { %1459 = vmatprep.mubr.msk.bf16.mxu0 %vm446_vm0, %v1728_v11  ;;  %1475 = vmatprep.mubr.msk.bf16.mxu1 %vm446_vm0, %v1730_v12 }
  0xa1   :  { %703 = vmatmul.mubr.bf16.gmra.mxu0 %v1732_v13  ;;  %831 = vmatmul.mubr.bf16.gmra.mxu1 %v1733_v14 }
  0xe9   :  { %v584_v16 = vpop.f32.mrf.mxu0  ;;  %v712_v18 = vpop.f32.mrf.mxu1 }
  0xea   :  { %v846_v19 = vmul.f32 %v2018_v15, %v584_v16  ;;  %v878_v20 = vmul.f32 %v2018_v15, %v712_v18 }
  0xeb   :  { %v586_v21 = vpop.f32.mrf.mxu0  ;;  %v714_v22 = vpop.f32.mrf.mxu1 }
  0xec   :  { %v917_v23 = vadd.f32 %v2023_v17, %v846_v19  ;;  %v949_v24 = vadd.f32 %v2023_v17, %v878_v20 }
  0xed   :  { %v587_v25 = vpop.f32.mrf.mxu0  ;;  %v715_v26 = vpop.f32.mrf.mxu1 }
  0xee   :  { %v981_v27 = vmax.f32 %v917_v23, 0.0  ;;  %v1013_v28 = vmax.f32 %v949_v24, 0.0  ;;  %v847_v29 = vmul.f32 %v2018_v15, %v587_v25  ;;  %v879_v30 = vmul.f32 %v2018_v15, %v715_v26 }
  0xef   :  { %v589_v31 = vpop.f32.mrf.mxu0  ;;  %v717_v32 = vpop.f32.mrf.mxu1 }
  0xf0   :  { %v1542_v33 = vpack.c.bf16 %v981_v27, %v981_v27  ;;  %v1574_v34 = vpack.c.bf16 %v1013_v28, %v1013_v28  ;;  %v918_v35 = vadd.f32 %v2023_v17, %v847_v29  ;;  %v950_v36 = vadd.f32 %v2023_v17, %v879_v30 }
  0xf1   :  { %v592_v37 = vpop.f32.mrf.mxu0  ;;  %v720_v38 = vpop.f32.mrf.mxu1 }
  0xf2   :  { %1302 = vst.msk [vmem:[%s2413_s4] sm:$0xf] %vm1301_vm3, %v1542_v33  ;;  %1334 = vst.msk [vmem:[%s2413_s4 + $0x80] sm:$0xf] %vm1301_vm3, %v1574_v34  ;;  %v982_v39 = vmax.f32 %v918_v35, 0.0  ;;  %v1014_v40 = vmax.f32 %v950_v36, 0.0  ;;  %v848_v41 = vmul.f32 %v2018_v15, %v592_v37  ;;  %v880_v42 = vmul.f32 %v2018_v15, %v720_v38 }
  0xf3   :  { %v594_v43 = vpop.f32.mrf.mxu0  ;;  %v722_v44 = vpop.f32.mrf.mxu1 }
  0xf4   :  { %v1543_v45 = vpack.c.bf16 %v982_v39, %v982_v39  ;;  %v1575_v46 = vpack.c.bf16 %v1014_v40, %v1014_v40  ;;  %v919_v47 = vadd.f32 %v2023_v17, %v848_v41  ;;  %v951_v48 = vadd.f32 %v2023_v17, %v880_v42 }
  0xf5   :  { %v595_v49 = vpop.f32.mrf.mxu0  ;;  %v723_v50 = vpop.f32.mrf.mxu1 }
  0xf6   :  { %1303 = vst.msk [vmem:[%s2413_s4 + $0x4] sm:$0xf] %vm1301_vm3, %v1543_v45  ;;  %1335 = vst.msk [vmem:[%s2413_s4 + $0x84] sm:$0xf] %vm1301_vm3, %v1575_v46  ;;  %v983_v51 = vmax.f32 %v919_v47, 0.0  ;;  %v1015_v52 = vmax.f32 %v951_v48, 0.0  ;;  %v849_v53 = vmul.f32 %v2018_v15, %v595_v49  ;;  %v881_v54 = vmul.f32 %v2018_v15, %v723_v50 }
  0xf7   :  { %v597_v55 = vpop.f32.mrf.mxu0  ;;  %v725_v56 = vpop.f32.mrf.mxu1 }
  0xf8   :  { %v1544_v57 = vpack.c.bf16 %v983_v51, %v983_v51  ;;  %v1576_v58 = vpack.c.bf16 %v1015_v52, %v1015_v52  ;;  %v920_v59 = vadd.f32 %v2023_v17, %v849_v53  ;;  %v952_v60 = vadd.f32 %v2023_v17, %v881_v54 }
  0xf9   :  { %v600_v61 = vpop.f32.mrf.mxu0  ;;  %v728_v62 = vpop.f32.mrf.mxu1 }
  0xfa   :  { %1304 = vst.msk [vmem:[%s2413_s4 + $0x8] sm:$0xf] %vm1301_vm3, %v1544_v57  ;;  %1336 = vst.msk [vmem:[%s2413_s4 + $0x88] sm:$0xf] %vm1301_vm3, %v1576_v58  ;;  %v984_v63 = vmax.f32 %v920_v59, 0.0  ;;  %v1016_v0 = vmax.f32 %v952_v60, 0.0  ;;  %v850_v1 = vmul.f32 %v2018_v15, %v600_v61  ;;  %v882_v2 = vmul.f32 %v2018_v15, %v728_v62 }
  0xfb   :  { %v602_v3 = vpop.f32.mrf.mxu0  ;;  %v730_v4 = vpop.f32.mrf.mxu1 }
  0xfc   :  { %v1545_v5 = vpack.c.bf16 %v984_v63, %v984_v63  ;;  %v1577_v6 = vpack.c.bf16 %v1016_v0, %v1016_v0  ;;  %v921_v7 = vadd.f32 %v2023_v17, %v850_v1  ;;  %v953_v8 = vadd.f32 %v2023_v17, %v882_v2 }
  0xfd   :  { %v603_v9 = vpop.f32.mrf.mxu0  ;;  %v731_v10 = vpop.f32.mrf.mxu1 }
  0xfe   :  { %1305 = vst.msk [vmem:[%s2413_s4 + $0xc] sm:$0xf] %vm1301_vm3, %v1545_v5  ;;  %1337 = vst.msk [vmem:[%s2413_s4 + $0x8c] sm:$0xf] %vm1301_vm3, %v1577_v6  ;;  %v985_v11 = vmax.f32 %v921_v7, 0.0  ;;  %v1017_v12 = vmax.f32 %v953_v8, 0.0  ;;  %v851_v13 = vmul.f32 %v2018_v15, %v603_v9  ;;  %v883_v14 = vmul.f32 %v2018_v15, %v731_v10 }
  0xff   :  { %v605_v16 = vpop.f32.mrf.mxu0  ;;  %v733_v18 = vpop.f32.mrf.mxu1 }
 0x100   :  { %v1546_v19 = vpack.c.bf16 %v985_v11, %v985_v11  ;;  %v1578_v20 = vpack.c.bf16 %v1017_v12, %v1017_v12  ;;  %v922_v21 = vadd.f32 %v2023_v17, %v851_v13  ;;  %v954_v22 = vadd.f32 %v2023_v17, %v883_v14 }
 0x101   :  { %v608_v23 = vpop.f32.mrf.mxu0  ;;  %v736_v24 = vpop.f32.mrf.mxu1 }
 0x102   :  { %1306 = vst.msk [vmem:[%s2413_s4 + $0x10] sm:$0xf] %vm1301_vm3, %v1546_v19  ;;  %1338 = vst.msk [vmem:[%s2413_s4 + $0x90] sm:$0xf] %vm1301_vm3, %v1578_v20  ;;  %v986_v25 = vmax.f32 %v922_v21, 0.0  ;;  %v1018_v26 = vmax.f32 %v954_v22, 0.0  ;;  %v852_v27 = vmul.f32 %v2018_v15, %v608_v23  ;;  %v884_v28 = vmul.f32 %v2018_v15, %v736_v24 }
 0x103   :  { %v610_v29 = vpop.f32.mrf.mxu0  ;;  %v738_v30 = vpop.f32.mrf.mxu1 }
 0x104   :  { %v1547_v31 = vpack.c.bf16 %v986_v25, %v986_v25  ;;  %v1579_v32 = vpack.c.bf16 %v1018_v26, %v1018_v26  ;;  %v923_v33 = vadd.f32 %v2023_v17, %v852_v27  ;;  %v955_v34 = vadd.f32 %v2023_v17, %v884_v28 }
 0x105   :  { %v611_v35 = vpop.f32.mrf.mxu0  ;;  %v739_v36 = vpop.f32.mrf.mxu1 }
 0x106   :  { %1307 = vst.msk [vmem:[%s2413_s4 + $0x14] sm:$0xf] %vm1301_vm3, %v1547_v31  ;;  %1339 = vst.msk [vmem:[%s2413_s4 + $0x94] sm:$0xf] %vm1301_vm3, %v1579_v32  ;;  %v987_v37 = vmax.f32 %v923_v33, 0.0  ;;  %v1019_v38 = vmax.f32 %v955_v34, 0.0  ;;  %v853_v39 = vmul.f32 %v2018_v15, %v611_v35  ;;  %v885_v40 = vmul.f32 %v2018_v15, %v739_v36 }
 0x107   :  { %v613_v41 = vpop.f32.mrf.mxu0  ;;  %v741_v42 = vpop.f32.mrf.mxu1 }
 0x108   :  { %v1548_v43 = vpack.c.bf16 %v987_v37, %v987_v37  ;;  %v1580_v44 = vpack.c.bf16 %v1019_v38, %v1019_v38  ;;  %v924_v45 = vadd.f32 %v2023_v17, %v853_v39  ;;  %v956_v46 = vadd.f32 %v2023_v17, %v885_v40 }
 0x109   :  { %v616_v47 = vpop.f32.mrf.mxu0  ;;  %v744_v48 = vpop.f32.mrf.mxu1 }
 0x10a   :  { %1308 = vst.msk [vmem:[%s2413_s4 + $0x18] sm:$0xf] %vm1301_vm3, %v1548_v43  ;;  %1340 = vst.msk [vmem:[%s2413_s4 + $0x98] sm:$0xf] %vm1301_vm3, %v1580_v44  ;;  %v988_v49 = vmax.f32 %v924_v45, 0.0  ;;  %v1020_v50 = vmax.f32 %v956_v46, 0.0  ;;  %v854_v51 = vmul.f32 %v2018_v15, %v616_v47  ;;  %v886_v52 = vmul.f32 %v2018_v15, %v744_v48 }
 0x10b   :  { %v618_v53 = vpop.f32.mrf.mxu0  ;;  %v746_v54 = vpop.f32.mrf.mxu1 }
 0x10c   :  { %v1549_v55 = vpack.c.bf16 %v988_v49, %v988_v49  ;;  %v1581_v56 = vpack.c.bf16 %v1020_v50, %v1020_v50  ;;  %v925_v57 = vadd.f32 %v2023_v17, %v854_v51  ;;  %v957_v58 = vadd.f32 %v2023_v17, %v886_v52 }
 0x10d   :  { %v619_v59 = vpop.f32.mrf.mxu0  ;;  %v747_v60 = vpop.f32.mrf.mxu1 }
 0x10e   :  { %1309 = vst.msk [vmem:[%s2413_s4 + $0x1c] sm:$0xf] %vm1301_vm3, %v1549_v55  ;;  %1341 = vst.msk [vmem:[%s2413_s4 + $0x9c] sm:$0xf] %vm1301_vm3, %v1581_v56  ;;  %v989_v61 = vmax.f32 %v925_v57, 0.0  ;;  %v1021_v62 = vmax.f32 %v957_v58, 0.0  ;;  %v855_v63 = vmul.f32 %v2018_v15, %v619_v59  ;;  %v887_v0 = vmul.f32 %v2018_v15, %v747_v60 }
 0x10f   :  { %v621_v1 = vpop.f32.mrf.mxu0  ;;  %v749_v2 = vpop.f32.mrf.mxu1 }
 0x110   :  { %v1550_v3 = vpack.c.bf16 %v989_v61, %v989_v61  ;;  %v1582_v4 = vpack.c.bf16 %v1021_v62, %v1021_v62  ;;  %v926_v5 = vadd.f32 %v2023_v17, %v855_v63  ;;  %v958_v6 = vadd.f32 %v2023_v17, %v887_v0 }
 0x111   :  { %v624_v7 = vpop.f32.mrf.mxu0  ;;  %v752_v8 = vpop.f32.mrf.mxu1 }
 0x112   :  { %1310 = vst.msk [vmem:[%s2413_s4 + $0x20] sm:$0xf] %vm1301_vm3, %v1550_v3  ;;  %1342 = vst.msk [vmem:[%s2413_s4 + $0xa0] sm:$0xf] %vm1301_vm3, %v1582_v4  ;;  %v990_v9 = vmax.f32 %v926_v5, 0.0  ;;  %v1022_v10 = vmax.f32 %v958_v6, 0.0  ;;  %v856_v11 = vmul.f32 %v2018_v15, %v624_v7  ;;  %v888_v12 = vmul.f32 %v2018_v15, %v752_v8 }
 0x113   :  { %v626_v13 = vpop.f32.mrf.mxu0  ;;  %v754_v14 = vpop.f32.mrf.mxu1 }
 0x114   :  { %v1551_v16 = vpack.c.bf16 %v990_v9, %v990_v9  ;;  %v1583_v18 = vpack.c.bf16 %v1022_v10, %v1022_v10  ;;  %v927_v19 = vadd.f32 %v2023_v17, %v856_v11  ;;  %v959_v20 = vadd.f32 %v2023_v17, %v888_v12 }
 0x115   :  { %v627_v21 = vpop.f32.mrf.mxu0  ;;  %v755_v22 = vpop.f32.mrf.mxu1 }
 0x116   :  { %1311 = vst.msk [vmem:[%s2413_s4 + $0x24] sm:$0xf] %vm1301_vm3, %v1551_v16  ;;  %1343 = vst.msk [vmem:[%s2413_s4 + $0xa4] sm:$0xf] %vm1301_vm3, %v1583_v18  ;;  %v991_v23 = vmax.f32 %v927_v19, 0.0  ;;  %v1023_v24 = vmax.f32 %v959_v20, 0.0  ;;  %v857_v25 = vmul.f32 %v2018_v15, %v627_v21  ;;  %v889_v26 = vmul.f32 %v2018_v15, %v755_v22 }
 0x117   :  { %v629_v27 = vpop.f32.mrf.mxu0  ;;  %v757_v28 = vpop.f32.mrf.mxu1 }
 0x118   :  { %v1552_v29 = vpack.c.bf16 %v991_v23, %v991_v23  ;;  %v1584_v30 = vpack.c.bf16 %v1023_v24, %v1023_v24  ;;  %v928_v31 = vadd.f32 %v2023_v17, %v857_v25  ;;  %v960_v32 = vadd.f32 %v2023_v17, %v889_v26 }
 0x119   :  { %v632_v33 = vpop.f32.mrf.mxu0  ;;  %v760_v34 = vpop.f32.mrf.mxu1 }
 0x11a   :  { %1312 = vst.msk [vmem:[%s2413_s4 + $0x28] sm:$0xf] %vm1301_vm3, %v1552_v29  ;;  %1344 = vst.msk [vmem:[%s2413_s4 + $0xa8] sm:$0xf] %vm1301_vm3, %v1584_v30  ;;  %v992_v35 = vmax.f32 %v928_v31, 0.0  ;;  %v1024_v36 = vmax.f32 %v960_v32, 0.0  ;;  %v858_v37 = vmul.f32 %v2018_v15, %v632_v33  ;;  %v890_v38 = vmul.f32 %v2018_v15, %v760_v34 }
 0x11b   :  { %v634_v39 = vpop.f32.mrf.mxu0  ;;  %v762_v40 = vpop.f32.mrf.mxu1 }
 0x11c   :  { %v1553_v41 = vpack.c.bf16 %v992_v35, %v992_v35  ;;  %v1585_v42 = vpack.c.bf16 %v1024_v36, %v1024_v36  ;;  %v929_v43 = vadd.f32 %v2023_v17, %v858_v37  ;;  %v961_v44 = vadd.f32 %v2023_v17, %v890_v38 }
 0x11d   :  { %v635_v45 = vpop.f32.mrf.mxu0  ;;  %v763_v46 = vpop.f32.mrf.mxu1 }
 0x11e   :  { %1313 = vst.msk [vmem:[%s2413_s4 + $0x2c] sm:$0xf] %vm1301_vm3, %v1553_v41  ;;  %1345 = vst.msk [vmem:[%s2413_s4 + $0xac] sm:$0xf] %vm1301_vm3, %v1585_v42  ;;  %v993_v47 = vmax.f32 %v929_v43, 0.0  ;;  %v1025_v48 = vmax.f32 %v961_v44, 0.0  ;;  %v859_v49 = vmul.f32 %v2018_v15, %v635_v45  ;;  %v891_v50 = vmul.f32 %v2018_v15, %v763_v46 }
 0x11f   :  { %v637_v51 = vpop.f32.mrf.mxu0  ;;  %v765_v52 = vpop.f32.mrf.mxu1 }
 0x120   :  { %v1554_v53 = vpack.c.bf16 %v993_v47, %v993_v47  ;;  %v1586_v54 = vpack.c.bf16 %v1025_v48, %v1025_v48  ;;  %v930_v55 = vadd.f32 %v2023_v17, %v859_v49  ;;  %v962_v56 = vadd.f32 %v2023_v17, %v891_v50 }
 0x121   :  { %v640_v57 = vpop.f32.mrf.mxu0  ;;  %v768_v58 = vpop.f32.mrf.mxu1 }
 0x122   :  { %1314 = vst.msk [vmem:[%s2413_s4 + $0x30] sm:$0xf] %vm1301_vm3, %v1554_v53  ;;  %1346 = vst.msk [vmem:[%s2413_s4 + $0xb0] sm:$0xf] %vm1301_vm3, %v1586_v54  ;;  %v994_v59 = vmax.f32 %v930_v55, 0.0  ;;  %v1026_v60 = vmax.f32 %v962_v56, 0.0  ;;  %v860_v61 = vmul.f32 %v2018_v15, %v640_v57  ;;  %v892_v62 = vmul.f32 %v2018_v15, %v768_v58 }
 0x123   :  { %v642_v63 = vpop.f32.mrf.mxu0  ;;  %v770_v0 = vpop.f32.mrf.mxu1 }
 0x124   :  { %v1555_v1 = vpack.c.bf16 %v994_v59, %v994_v59  ;;  %v1587_v2 = vpack.c.bf16 %v1026_v60, %v1026_v60  ;;  %v931_v3 = vadd.f32 %v2023_v17, %v860_v61  ;;  %v963_v4 = vadd.f32 %v2023_v17, %v892_v62 }
 0x125   :  { %v643_v5 = vpop.f32.mrf.mxu0  ;;  %v771_v6 = vpop.f32.mrf.mxu1 }
 0x126   :  { %1315 = vst.msk [vmem:[%s2413_s4 + $0x34] sm:$0xf] %vm1301_vm3, %v1555_v1  ;;  %1347 = vst.msk [vmem:[%s2413_s4 + $0xb4] sm:$0xf] %vm1301_vm3, %v1587_v2  ;;  %v995_v7 = vmax.f32 %v931_v3, 0.0  ;;  %v1027_v8 = vmax.f32 %v963_v4, 0.0  ;;  %v861_v9 = vmul.f32 %v2018_v15, %v643_v5  ;;  %v893_v10 = vmul.f32 %v2018_v15, %v771_v6 }
 0x127   :  { %v645_v11 = vpop.f32.mrf.mxu0  ;;  %v773_v12 = vpop.f32.mrf.mxu1 }
 0x128   :  { %v1556_v13 = vpack.c.bf16 %v995_v7, %v995_v7  ;;  %v1588_v14 = vpack.c.bf16 %v1027_v8, %v1027_v8  ;;  %v932_v16 = vadd.f32 %v2023_v17, %v861_v9  ;;  %v964_v18 = vadd.f32 %v2023_v17, %v893_v10 }
 0x129   :  { %v648_v19 = vpop.f32.mrf.mxu0  ;;  %v776_v20 = vpop.f32.mrf.mxu1 }
 0x12a   :  { %1316 = vst.msk [vmem:[%s2413_s4 + $0x38] sm:$0xf] %vm1301_vm3, %v1556_v13  ;;  %1348 = vst.msk [vmem:[%s2413_s4 + $0xb8] sm:$0xf] %vm1301_vm3, %v1588_v14  ;;  %v996_v21 = vmax.f32 %v932_v16, 0.0  ;;  %v1028_v22 = vmax.f32 %v964_v18, 0.0  ;;  %v862_v23 = vmul.f32 %v2018_v15, %v648_v19  ;;  %v894_v24 = vmul.f32 %v2018_v15, %v776_v20 }
 0x12b   :  { %v650_v25 = vpop.f32.mrf.mxu0  ;;  %v778_v26 = vpop.f32.mrf.mxu1 }
 0x12c   :  { %v1557_v27 = vpack.c.bf16 %v996_v21, %v996_v21  ;;  %v1589_v28 = vpack.c.bf16 %v1028_v22, %v1028_v22  ;;  %v933_v29 = vadd.f32 %v2023_v17, %v862_v23  ;;  %v965_v30 = vadd.f32 %v2023_v17, %v894_v24 }
 0x12d   :  { %v651_v31 = vpop.f32.mrf.mxu0  ;;  %v779_v32 = vpop.f32.mrf.mxu1 }
 0x12e   :  { %1317 = vst.msk [vmem:[%s2413_s4 + $0x3c] sm:$0xf] %vm1301_vm3, %v1557_v27  ;;  %1349 = vst.msk [vmem:[%s2413_s4 + $0xbc] sm:$0xf] %vm1301_vm3, %v1589_v28  ;;  %v997_v33 = vmax.f32 %v933_v29, 0.0  ;;  %v1029_v34 = vmax.f32 %v965_v30, 0.0  ;;  %v863_v35 = vmul.f32 %v2018_v15, %v651_v31  ;;  %v895_v36 = vmul.f32 %v2018_v15, %v779_v32 }
 0x12f   :  { %v653_v37 = vpop.f32.mrf.mxu0  ;;  %v781_v38 = vpop.f32.mrf.mxu1 }
 0x130   :  { %v1558_v39 = vpack.c.bf16 %v997_v33, %v997_v33  ;;  %v1590_v40 = vpack.c.bf16 %v1029_v34, %v1029_v34  ;;  %v934_v41 = vadd.f32 %v2023_v17, %v863_v35  ;;  %v966_v42 = vadd.f32 %v2023_v17, %v895_v36 }
 0x131   :  { %v656_v43 = vpop.f32.mrf.mxu0  ;;  %v784_v44 = vpop.f32.mrf.mxu1 }
 0x132   :  { %1318 = vst.msk [vmem:[%s2413_s4 + $0x40] sm:$0xf] %vm1301_vm3, %v1558_v39  ;;  %1350 = vst.msk [vmem:[%s2413_s4 + $0xc0] sm:$0xf] %vm1301_vm3, %v1590_v40  ;;  %v998_v45 = vmax.f32 %v934_v41, 0.0  ;;  %v1030_v46 = vmax.f32 %v966_v42, 0.0  ;;  %v864_v47 = vmul.f32 %v2018_v15, %v656_v43  ;;  %v896_v48 = vmul.f32 %v2018_v15, %v784_v44 }
 0x133   :  { %v658_v49 = vpop.f32.mrf.mxu0  ;;  %v786_v50 = vpop.f32.mrf.mxu1 }
 0x134   :  { %v1559_v51 = vpack.c.bf16 %v998_v45, %v998_v45  ;;  %v1591_v52 = vpack.c.bf16 %v1030_v46, %v1030_v46  ;;  %v935_v53 = vadd.f32 %v2023_v17, %v864_v47  ;;  %v967_v54 = vadd.f32 %v2023_v17, %v896_v48 }
 0x135   :  { %v659_v55 = vpop.f32.mrf.mxu0  ;;  %v787_v56 = vpop.f32.mrf.mxu1 }
 0x136   :  { %1319 = vst.msk [vmem:[%s2413_s4 + $0x44] sm:$0xf] %vm1301_vm3, %v1559_v51  ;;  %1351 = vst.msk [vmem:[%s2413_s4 + $0xc4] sm:$0xf] %vm1301_vm3, %v1591_v52  ;;  %v999_v57 = vmax.f32 %v935_v53, 0.0  ;;  %v1031_v58 = vmax.f32 %v967_v54, 0.0  ;;  %v865_v59 = vmul.f32 %v2018_v15, %v659_v55  ;;  %v897_v60 = vmul.f32 %v2018_v15, %v787_v56 }
 0x137   :  { %v661_v61 = vpop.f32.mrf.mxu0  ;;  %v789_v62 = vpop.f32.mrf.mxu1 }
 0x138   :  { %v1560_v63 = vpack.c.bf16 %v999_v57, %v999_v57  ;;  %v1592_v0 = vpack.c.bf16 %v1031_v58, %v1031_v58  ;;  %v936_v1 = vadd.f32 %v2023_v17, %v865_v59  ;;  %v968_v2 = vadd.f32 %v2023_v17, %v897_v60 }
 0x139   :  { %v664_v3 = vpop.f32.mrf.mxu0  ;;  %v792_v4 = vpop.f32.mrf.mxu1 }
 0x13a   :  { %1320 = vst.msk [vmem:[%s2413_s4 + $0x48] sm:$0xf] %vm1301_vm3, %v1560_v63  ;;  %1352 = vst.msk [vmem:[%s2413_s4 + $0xc8] sm:$0xf] %vm1301_vm3, %v1592_v0  ;;  %v1000_v5 = vmax.f32 %v936_v1, 0.0  ;;  %v1032_v6 = vmax.f32 %v968_v2, 0.0  ;;  %v866_v7 = vmul.f32 %v2018_v15, %v664_v3  ;;  %v898_v8 = vmul.f32 %v2018_v15, %v792_v4 }
 0x13b   :  { %v666_v9 = vpop.f32.mrf.mxu0  ;;  %v794_v10 = vpop.f32.mrf.mxu1 }
 0x13c   :  { %v1561_v11 = vpack.c.bf16 %v1000_v5, %v1000_v5  ;;  %v1593_v12 = vpack.c.bf16 %v1032_v6, %v1032_v6  ;;  %v937_v13 = vadd.f32 %v2023_v17, %v866_v7  ;;  %v969_v14 = vadd.f32 %v2023_v17, %v898_v8 }
 0x13d   :  { %v667_v16 = vpop.f32.mrf.mxu0  ;;  %v795_v18 = vpop.f32.mrf.mxu1 }
 0x13e   :  { %1321 = vst.msk [vmem:[%s2413_s4 + $0x4c] sm:$0xf] %vm1301_vm3, %v1561_v11  ;;  %1353 = vst.msk [vmem:[%s2413_s4 + $0xcc] sm:$0xf] %vm1301_vm3, %v1593_v12  ;;  %v1001_v19 = vmax.f32 %v937_v13, 0.0  ;;  %v1033_v20 = vmax.f32 %v969_v14, 0.0  ;;  %v867_v21 = vmul.f32 %v2018_v15, %v667_v16  ;;  %v899_v22 = vmul.f32 %v2018_v15, %v795_v18 }
 0x13f   :  { %v669_v23 = vpop.f32.mrf.mxu0  ;;  %v797_v24 = vpop.f32.mrf.mxu1 }
 0x140   :  { %v1562_v25 = vpack.c.bf16 %v1001_v19, %v1001_v19  ;;  %v1594_v26 = vpack.c.bf16 %v1033_v20, %v1033_v20  ;;  %v938_v27 = vadd.f32 %v2023_v17, %v867_v21  ;;  %v970_v28 = vadd.f32 %v2023_v17, %v899_v22 }
 0x141   :  { %v672_v29 = vpop.f32.mrf.mxu0  ;;  %v800_v30 = vpop.f32.mrf.mxu1 }
 0x142   :  { %1322 = vst.msk [vmem:[%s2413_s4 + $0x50] sm:$0xf] %vm1301_vm3, %v1562_v25  ;;  %1354 = vst.msk [vmem:[%s2413_s4 + $0xd0] sm:$0xf] %vm1301_vm3, %v1594_v26  ;;  %v1002_v31 = vmax.f32 %v938_v27, 0.0  ;;  %v1034_v32 = vmax.f32 %v970_v28, 0.0  ;;  %v868_v33 = vmul.f32 %v2018_v15, %v672_v29  ;;  %v900_v34 = vmul.f32 %v2018_v15, %v800_v30 }
 0x143   :  { %v674_v35 = vpop.f32.mrf.mxu0  ;;  %v802_v36 = vpop.f32.mrf.mxu1 }
 0x144   :  { %v1563_v37 = vpack.c.bf16 %v1002_v31, %v1002_v31  ;;  %v1595_v38 = vpack.c.bf16 %v1034_v32, %v1034_v32  ;;  %v939_v39 = vadd.f32 %v2023_v17, %v868_v33  ;;  %v971_v40 = vadd.f32 %v2023_v17, %v900_v34 }
 0x145   :  { %v675_v41 = vpop.f32.mrf.mxu0  ;;  %v803_v42 = vpop.f32.mrf.mxu1 }
 0x146   :  { %1323 = vst.msk [vmem:[%s2413_s4 + $0x54] sm:$0xf] %vm1301_vm3, %v1563_v37  ;;  %1355 = vst.msk [vmem:[%s2413_s4 + $0xd4] sm:$0xf] %vm1301_vm3, %v1595_v38  ;;  %v1003_v43 = vmax.f32 %v939_v39, 0.0  ;;  %v1035_v44 = vmax.f32 %v971_v40, 0.0  ;;  %v869_v45 = vmul.f32 %v2018_v15, %v675_v41  ;;  %v901_v46 = vmul.f32 %v2018_v15, %v803_v42 }
 0x147   :  { %v677_v47 = vpop.f32.mrf.mxu0  ;;  %v805_v48 = vpop.f32.mrf.mxu1 }
 0x148   :  { %v1564_v49 = vpack.c.bf16 %v1003_v43, %v1003_v43  ;;  %v1596_v50 = vpack.c.bf16 %v1035_v44, %v1035_v44  ;;  %v940_v51 = vadd.f32 %v2023_v17, %v869_v45  ;;  %v972_v52 = vadd.f32 %v2023_v17, %v901_v46 }
 0x149   :  { %v680_v53 = vpop.f32.mrf.mxu0  ;;  %v808_v54 = vpop.f32.mrf.mxu1 }
 0x14a   :  { %1324 = vst.msk [vmem:[%s2413_s4 + $0x58] sm:$0xf] %vm1301_vm3, %v1564_v49  ;;  %1356 = vst.msk [vmem:[%s2413_s4 + $0xd8] sm:$0xf] %vm1301_vm3, %v1596_v50  ;;  %v1004_v55 = vmax.f32 %v940_v51, 0.0  ;;  %v1036_v56 = vmax.f32 %v972_v52, 0.0  ;;  %v870_v57 = vmul.f32 %v2018_v15, %v680_v53  ;;  %v902_v58 = vmul.f32 %v2018_v15, %v808_v54 }
 0x14b   :  { %v682_v59 = vpop.f32.mrf.mxu0  ;;  %v810_v60 = vpop.f32.mrf.mxu1 }
 0x14c   :  { %v1565_v61 = vpack.c.bf16 %v1004_v55, %v1004_v55  ;;  %v1597_v62 = vpack.c.bf16 %v1036_v56, %v1036_v56  ;;  %v941_v63 = vadd.f32 %v2023_v17, %v870_v57  ;;  %v973_v0 = vadd.f32 %v2023_v17, %v902_v58 }
 0x14d   :  { %v683_v1 = vpop.f32.mrf.mxu0  ;;  %v811_v2 = vpop.f32.mrf.mxu1 }
 0x14e   :  { %1325 = vst.msk [vmem:[%s2413_s4 + $0x5c] sm:$0xf] %vm1301_vm3, %v1565_v61  ;;  %1357 = vst.msk [vmem:[%s2413_s4 + $0xdc] sm:$0xf] %vm1301_vm3, %v1597_v62  ;;  %v1005_v3 = vmax.f32 %v941_v63, 0.0  ;;  %v1037_v4 = vmax.f32 %v973_v0, 0.0  ;;  %v871_v5 = vmul.f32 %v2018_v15, %v683_v1  ;;  %v903_v6 = vmul.f32 %v2018_v15, %v811_v2 }
 0x14f   :  { %v685_v7 = vpop.f32.mrf.mxu0  ;;  %v813_v8 = vpop.f32.mrf.mxu1 }
 0x150   :  { %v1566_v9 = vpack.c.bf16 %v1005_v3, %v1005_v3  ;;  %v1598_v10 = vpack.c.bf16 %v1037_v4, %v1037_v4  ;;  %v942_v11 = vadd.f32 %v2023_v17, %v871_v5  ;;  %v974_v12 = vadd.f32 %v2023_v17, %v903_v6 }
 0x151   :  { %v688_v13 = vpop.f32.mrf.mxu0  ;;  %v816_v14 = vpop.f32.mrf.mxu1 }
 0x152   :  { %1326 = vst.msk [vmem:[%s2413_s4 + $0x60] sm:$0xf] %vm1301_vm3, %v1566_v9  ;;  %1358 = vst.msk [vmem:[%s2413_s4 + $0xe0] sm:$0xf] %vm1301_vm3, %v1598_v10  ;;  %v1006_v16 = vmax.f32 %v942_v11, 0.0  ;;  %v1038_v18 = vmax.f32 %v974_v12, 0.0  ;;  %v872_v19 = vmul.f32 %v2018_v15, %v688_v13  ;;  %v904_v20 = vmul.f32 %v2018_v15, %v816_v14 }
 0x153   :  { %v690_v21 = vpop.f32.mrf.mxu0  ;;  %v818_v22 = vpop.f32.mrf.mxu1 }
 0x154   :  { %v1567_v23 = vpack.c.bf16 %v1006_v16, %v1006_v16  ;;  %v1599_v24 = vpack.c.bf16 %v1038_v18, %v1038_v18  ;;  %v943_v25 = vadd.f32 %v2023_v17, %v872_v19  ;;  %v975_v26 = vadd.f32 %v2023_v17, %v904_v20 }
 0x155   :  { %v691_v27 = vpop.f32.mrf.mxu0  ;;  %v819_v28 = vpop.f32.mrf.mxu1 }
 0x156   :  { %1327 = vst.msk [vmem:[%s2413_s4 + $0x64] sm:$0xf] %vm1301_vm3, %v1567_v23  ;;  %1359 = vst.msk [vmem:[%s2413_s4 + $0xe4] sm:$0xf] %vm1301_vm3, %v1599_v24  ;;  %v1007_v29 = vmax.f32 %v943_v25, 0.0  ;;  %v1039_v30 = vmax.f32 %v975_v26, 0.0  ;;  %v873_v31 = vmul.f32 %v2018_v15, %v691_v27  ;;  %v905_v32 = vmul.f32 %v2018_v15, %v819_v28 }
 0x157   :  { %v693_v33 = vpop.f32.mrf.mxu0  ;;  %v821_v34 = vpop.f32.mrf.mxu1 }
 0x158   :  { %v1568_v35 = vpack.c.bf16 %v1007_v29, %v1007_v29  ;;  %v1600_v36 = vpack.c.bf16 %v1039_v30, %v1039_v30  ;;  %v944_v37 = vadd.f32 %v2023_v17, %v873_v31  ;;  %v976_v38 = vadd.f32 %v2023_v17, %v905_v32 }
 0x159   :  { %v696_v39 = vpop.f32.mrf.mxu0  ;;  %v824_v40 = vpop.f32.mrf.mxu1 }
 0x15a   :  { %1328 = vst.msk [vmem:[%s2413_s4 + $0x68] sm:$0xf] %vm1301_vm3, %v1568_v35  ;;  %1360 = vst.msk [vmem:[%s2413_s4 + $0xe8] sm:$0xf] %vm1301_vm3, %v1600_v36  ;;  %v1008_v41 = vmax.f32 %v944_v37, 0.0  ;;  %v1040_v42 = vmax.f32 %v976_v38, 0.0  ;;  %v874_v43 = vmul.f32 %v2018_v15, %v696_v39  ;;  %v906_v44 = vmul.f32 %v2018_v15, %v824_v40 }
 0x15b   :  { %v698_v45 = vpop.f32.mrf.mxu0  ;;  %v826_v46 = vpop.f32.mrf.mxu1 }
 0x15c   :  { %v1569_v47 = vpack.c.bf16 %v1008_v41, %v1008_v41  ;;  %v1601_v48 = vpack.c.bf16 %v1040_v42, %v1040_v42  ;;  %v945_v49 = vadd.f32 %v2023_v17, %v874_v43  ;;  %v977_v50 = vadd.f32 %v2023_v17, %v906_v44 }
 0x15d   :  { %v699_v51 = vpop.f32.mrf.mxu0  ;;  %v827_v52 = vpop.f32.mrf.mxu1 }
 0x15e   :  { %1329 = vst.msk [vmem:[%s2413_s4 + $0x6c] sm:$0xf] %vm1301_vm3, %v1569_v47  ;;  %1361 = vst.msk [vmem:[%s2413_s4 + $0xec] sm:$0xf] %vm1301_vm3, %v1601_v48  ;;  %v1009_v53 = vmax.f32 %v945_v49, 0.0  ;;  %v1041_v54 = vmax.f32 %v977_v50, 0.0  ;;  %v875_v55 = vmul.f32 %v2018_v15, %v699_v51  ;;  %v907_v56 = vmul.f32 %v2018_v15, %v827_v52 }
 0x15f   :  { %v701_v57 = vpop.f32.mrf.mxu0  ;;  %v829_v58 = vpop.f32.mrf.mxu1 }
 0x160   :  { %v1570_v59 = vpack.c.bf16 %v1009_v53, %v1009_v53  ;;  %v1602_v60 = vpack.c.bf16 %v1041_v54, %v1041_v54  ;;  %v946_v61 = vadd.f32 %v2023_v17, %v875_v55  ;;  %v978_v62 = vadd.f32 %v2023_v17, %v907_v56 }
 0x161   :  { %v704_v63 = vpop.f32.mrf.mxu0  ;;  %v832_v0 = vpop.f32.mrf.mxu1 }
 0x162   :  { %1330 = vst.msk [vmem:[%s2413_s4 + $0x70] sm:$0xf] %vm1301_vm3, %v1570_v59  ;;  %1362 = vst.msk [vmem:[%s2413_s4 + $0xf0] sm:$0xf] %vm1301_vm3, %v1602_v60  ;;  %v1010_v1 = vmax.f32 %v946_v61, 0.0  ;;  %v1042_v2 = vmax.f32 %v978_v62, 0.0  ;;  %v876_v3 = vmul.f32 %v2018_v15, %v704_v63  ;;  %v908_v4 = vmul.f32 %v2018_v15, %v832_v0 }
 0x163   :  { %v706_v5 = vpop.f32.mrf.mxu0  ;;  %v834_v6 = vpop.f32.mrf.mxu1 }
 0x164   :  { %v1571_v7 = vpack.c.bf16 %v1010_v1, %v1010_v1  ;;  %v1603_v8 = vpack.c.bf16 %v1042_v2, %v1042_v2  ;;  %v947_v9 = vadd.f32 %v2023_v17, %v876_v3  ;;  %v979_v10 = vadd.f32 %v2023_v17, %v908_v4 }
 0x165   :  { %v707_v11 = vpop.f32.mrf.mxu0  ;;  %v835_v12 = vpop.f32.mrf.mxu1 }
 0x166   :  { %1331 = vst.msk [vmem:[%s2413_s4 + $0x74] sm:$0xf] %vm1301_vm3, %v1571_v7  ;;  %1363 = vst.msk [vmem:[%s2413_s4 + $0xf4] sm:$0xf] %vm1301_vm3, %v1603_v8  ;;  %v1011_v13 = vmax.f32 %v947_v9, 0.0  ;;  %v1043_v14 = vmax.f32 %v979_v10, 0.0  ;;  %v877_v16 = vmul.f32 %v2018_v15, %v707_v11  ;;  %v909_v18 = vmul.f32 %v2018_v15, %v835_v12 }
 0x167   :  { %v709_v19 = vpop.f32.mrf.mxu0  ;;  %v837_v20 = vpop.f32.mrf.mxu1 }
 0x168   :  { %v1572_v21 = vpack.c.bf16 %v1011_v13, %v1011_v13  ;;  %v1604_v22 = vpack.c.bf16 %v1043_v14, %v1043_v14  ;;  %v948_v23 = vadd.f32 %v2023_v17, %v877_v16  ;;  %v980_v24 = vadd.f32 %v2023_v17, %v909_v18 }
 0x16a   :  { %1332 = vst.msk [vmem:[%s2413_s4 + $0x78] sm:$0xf] %vm1301_vm3, %v1572_v21  ;;  %1364 = vst.msk [vmem:[%s2413_s4 + $0xf8] sm:$0xf] %vm1301_vm3, %v1604_v22  ;;  %v1012_v25 = vmax.f32 %v948_v23, 0.0  ;;  %v1044_v15 = vmax.f32 %v980_v24, 0.0 }
 0x16c   :  { %v1573_v26 = vpack.c.bf16 %v1012_v25, %v1012_v25  ;;  %v1605_v27 = vpack.c.bf16 %v1044_v15, %v1044_v15 }
 0x16e   :  { %1333 = vst.msk [vmem:[%s2413_s4 + $0x7c] sm:$0xf] %vm1301_vm3, %v1573_v26  ;;  %1365 = vst.msk [vmem:[%s2413_s4 + $0xfc] sm:$0xf] %vm1301_vm3, %v1605_v27 }

</bundles_post_ra>
